<compile_context>
chip_gen: v6e
topology: v6e:2x2x1
jax: 0.10.0
libtpu: 0.0.40
codegen_flags: <defaults>
</compile_context>

<pallas_src>
import math
import jax
import jax.numpy as jnp
from jax.experimental import pallas as pl
from jax.experimental.pallas import tpu as pltpu


def _round_up(x, m):
    return ((x + m - 1) // m) * m


# ----------------------------------------------------------------------------
# Plain-JAX helpers (reproduce get_index_embedding / get_time_embedding).
# These build tiny [num_res, c] / [b, c] tables; everything hot (masking,
# motif select, broadcast and the Linear matmul) is fused in the kernel.
# ----------------------------------------------------------------------------
def get_index_embedding(indices, embed_size, max_len=2056):
    k = jnp.arange(embed_size // 2, dtype=jnp.float32)
    denom = max_len ** (2.0 * k / embed_size)
    arg = indices[..., None] * math.pi / denom
    return jnp.concatenate([jnp.sin(arg), jnp.cos(arg)], axis=-1)


def get_time_embedding(timesteps, embedding_dim, max_positions=2000):
    assert timesteps.ndim == 1
    assert embedding_dim % 2 == 0
    timesteps = timesteps * max_positions
    half_dim = embedding_dim // 2
    emb = math.log(max_positions) / (half_dim - 1)
    emb = jnp.exp(jnp.arange(half_dim, dtype=jnp.float32) * -emb)
    emb = timesteps.astype(jnp.float32)[:, None] * emb[None, :]
    return jnp.concatenate([jnp.sin(emb), jnp.cos(emb)], axis=-1)


# ----------------------------------------------------------------------------
# Pallas kernel.  One grid step = one (residue-tile, batch) pair:
#   pos_ref:  [TM, c_pos_pad]       positional-embedding rows (io_dtype)
#   mm_ref:   [TM, 2]               lane 0 = mask (0/1), lane 1 = motif (0/1)
#   t1wt_ref: [1, c_s_pad]          t1_emb @ W_time  (f32, batch-invariant)
#   dwt_ref:  [1, 1, c_s_pad]       (t_emb - t1_emb) @ W_time for this batch
#   wp_ref:   [c_pos_pad, c_s_pad]  W_pos half of the Linear weight (io_dtype)
#   b_ref:    [1, c_s_pad]          Linear bias (f32)
#   out_ref:  [TM, c_s_pad]         lane-dense output tile
# ----------------------------------------------------------------------------
def node_embedder_kernel(pos_ref, mm_ref, t1wt_ref, dwt_ref, wp_ref, b_ref,
                         out_ref):
    mm = mm_ref[...]
    mask = mm[:, 0:1]            # [TM, 1]  exact 0/1
    motif = mm[:, 1:2]           # [TM, 1]  exact 0/1 (pre-binarized in wrapper)

    # Positional branch on the MXU; f32 accumulation regardless of io dtype.
    acc = jnp.dot(pos_ref[...], wp_ref[...],
                  preferred_element_type=jnp.float32)        # [TM, c_s_pad]

    # Timestep branch (rank-2 in row space, precomputed in the wrapper):
    #   time_term = t1_emb @ Wt + motif * ((t_emb - t1_emb) @ Wt)
    time_term = t1wt_ref[...] + motif * dwt_ref[0]            # [TM, c_s_pad]

    # mask is a per-row 0/1 scalar -> commutes with the contraction; apply it
    # once after the matmul.  bias is NOT masked (matches the reference).
    out = mask * (acc + time_term) + b_ref[...]
    out_ref[...] = out.astype(out_ref.dtype)


def _choose_row_tile(num_res):
    # Prefer the largest tile <= 512 that divides num_res exactly (no padded
    # rows, no epilogue row-slice); otherwise cap at 512.  Per-tile VMEM is a
    # few hundred KiB, comfortably inside every generation's budget
    # (including v7x's 64 MiB).
    for cand in (512, 256, 128):
        if num_res >= cand and num_res % cand == 0:
            return cand
    if num_res > 512:
        return 512
    return _round_up(num_res, 8)


def node_embedder_forward(timesteps, mask, motif_mask, w_t, bias,
                          c_pos_emb, c_timestep_emb, c_s,
                          io_dtype=jnp.bfloat16, out_dtype=jnp.float32):
    """timesteps: [b, 1] in [0, 1]; mask, motif_mask: [b, num_res]; w_t: [d_in, c_s]."""
    b, num_res = mask.shape
    mask = mask.astype(jnp.float32)
    motif_bin = (motif_mask != 0).astype(jnp.float32)     # exact 0/1, in wrapper

    # ---- tiling / lane-padding constants -----------------------------------
    tm = _choose_row_tile(num_res)
    num_res_pad = _round_up(num_res, tm)
    n_res_tiles = num_res_pad // tm
    rows = b * num_res_pad
    c_pos_pad = _round_up(c_pos_emb, 128)
    c_s_pad = _round_up(c_s, 128)

    # ---- tiny embedding tables (glue, f32) ----------------------------------
    pos = jnp.arange(num_res, dtype=jnp.float32)
    pos_emb = get_index_embedding(pos, c_pos_emb, max_len=2056)          # [num_res, c_pos]
    # max_positions=2056 matches the original PyTorch NodeEmbedder.embed_t_2.
    t_emb = get_time_embedding(timesteps[:, 0], c_timestep_emb, 2056)    # [b, c_t]
    t1_emb = get_time_embedding(jnp.ones((b,), jnp.float32),
                                c_timestep_emb, 2056)                    # [b, c_t]

    # ---- collapse the rank-2 timestep branch against W_time -----------------
    w_pos = w_t[:c_pos_emb]                # [c_pos, c_s]
    w_time = w_t[c_pos_emb:]               # [c_t,  c_s]
    t1wt = t1_emb[:1] @ w_time             # [1, c_s]  (t1 rows are identical)
    dwt = (t_emb - t1_emb) @ w_time        # [b, c_s]

    # ---- zero-pad so every block is (8, 128)-aligned and lane-dense ---------
    pos_emb_p = jnp.pad(pos_emb, ((0, num_res_pad - num_res),
                                  (0, c_pos_pad - c_pos_emb))).astype(io_dtype)
    w_pos_p = jnp.pad(w_pos, ((0, c_pos_pad - c_pos_emb),
                              (0, c_s_pad - c_s))).astype(io_dtype)
    t1wt_p = jnp.pad(t1wt, ((0, 0), (0, c_s_pad - c_s)))                  # [1, c_s_pad] f32
    dwt_p = jnp.pad(dwt, ((0, 0), (0, c_s_pad - c_s)))[:, None, :]        # [b, 1, c_s_pad] f32
    bias_p = jnp.pad(bias, (0, c_s_pad - c_s))[None, :]                   # [1, c_s_pad] f32

    mm = jnp.stack([mask, motif_bin], axis=-1)                            # [b, num_res, 2]
    mm = jnp.pad(mm, ((0, 0), (0, num_res_pad - num_res), (0, 0)))
    mm = mm.reshape(rows, 2)                                              # [rows, 2]

    # Residue tile OUTER, batch INNER (fastest): the pos block index stays
    # constant while bi sweeps, so Pallas skips re-DMAing the pos tile.
    grid = (n_res_tiles, b)
    out = pl.pallas_call(
        node_embedder_kernel,
        out_shape=jax.ShapeDtypeStruct((rows, c_s_pad), out_dtype),
        grid_spec=pltpu.PrefetchScalarGridSpec(
            num_scalar_prefetch=0,
            grid=grid,
            in_specs=[
                # pos-embedding tile: indexed by residue tile only (reused
                # across the whole inner batch sweep).
                pl.BlockSpec((tm, c_pos_pad), lambda r, bi: (r, 0)),
                # packed mask/motif rows for this (batch, residue-tile).
                pl.BlockSpec((tm, 2), lambda r, bi: (bi * n_res_tiles + r, 0)),
                # t1 @ W_time: grid-invariant.
                pl.BlockSpec((1, c_s_pad), lambda r, bi: (0, 0)),
                # per-batch (t - t1) @ W_time row.
                pl.BlockSpec((1, 1, c_s_pad), lambda r, bi: (bi, 0, 0)),
                # W_pos and bias: grid-invariant (resident).
                pl.BlockSpec((c_pos_pad, c_s_pad), lambda r, bi: (0, 0)),
                pl.BlockSpec((1, c_s_pad), lambda r, bi: (0, 0)),
            ],
            out_specs=pl.BlockSpec((tm, c_s_pad),
                                   lambda r, bi: (bi * n_res_tiles + r, 0)),
        ),
        compiler_params=pltpu.CompilerParams(
            dimension_semantics=("parallel", "parallel")),
    )(pos_emb_p, mm, t1wt_p, dwt_p, w_pos_p, bias_p)

    # When tm | num_res and c_s % 128 == 0 this slice is a no-op; otherwise it
    # materializes a copy (wasted bandwidth but numerically harmless).
    out = out.reshape(b, num_res_pad, c_s_pad)[:, :num_res, :c_s]
    return out


# ----------------------------------------------------------------------------
# Pure-JAX reference (mirrors the PyTorch forward) for correctness checks.
# ----------------------------------------------------------------------------
def reference_forward(timesteps, mask, motif_mask, w_t, bias,
                      c_pos_emb, c_timestep_emb):
    b, num_res = mask.shape
    pos = jnp.arange(num_res, dtype=jnp.float32)
    pos_emb = get_index_embedding(pos, c_pos_emb, max_len=2056)
    pos_emb = jnp.broadcast_to(pos_emb[None], (b, num_res, c_pos_emb))
    pos_emb = pos_emb * mask[..., None]

    t_emb = get_time_embedding(timesteps[:, 0], c_timestep_emb, 2056)[:, None, :]
    t_emb = jnp.broadcast_to(t_emb, (b, num_res, c_timestep_emb)) * mask[..., None]
    tm_emb = get_time_embedding(jnp.ones_like(timesteps)[:, 0],
                                c_timestep_emb, 2056)[:, None, :]
    tm_emb = jnp.broadcast_to(tm_emb, (b, num_res, c_timestep_emb)) * mask[..., None]
    t_feat = jnp.where(motif_mask[..., None] == 0, tm_emb, t_emb)

    feats = jnp.concatenate([pos_emb, t_feat], axis=-1)
    return feats @ w_t + bias[None, None, :]


if __name__ == "__main__":
    # Small config consistent with the module: c_pos_emb, c_timestep_emb, c_s.
    b, num_res = 2, 16
    c_pos_emb, c_timestep_emb, c_s = 32, 32, 64
    d_in = c_pos_emb + c_timestep_emb

    key = jax.random.PRNGKey(0)
    k_w, k_b, k_t, k_mask, k_motif = jax.random.split(key, 5)

    # Deterministic parameter init (Linear(d_in, c_s)); w_t is the transposed weight.
    w_t = (jax.random.normal(k_w, (d_in, c_s), dtype=jnp.float32)
           * (1.0 / math.sqrt(d_in)))
    bias = jax.random.normal(k_b, (c_s,), dtype=jnp.float32) * 0.01

    # Inputs.
    timesteps = jax.random.uniform(k_t, (b, 1), dtype=jnp.float32)          # t in [0, 1)
    mask = (jax.random.uniform(k_mask, (b, num_res)) > 0.2).astype(jnp.float32)
    motif_mask = (jax.random.uniform(k_motif, (b, num_res)) > 0.5).astype(jnp.float32)

    ref = reference_forward(timesteps, mask, motif_mask, w_t, bias,
                            c_pos_emb, c_timestep_emb)

    # 1) Full-precision path: tight tolerance against the reference.
    out_f32 = node_embedder_forward(timesteps, mask, motif_mask, w_t, bias,
                                    c_pos_emb, c_timestep_emb, c_s,
                                    io_dtype=jnp.float32, out_dtype=jnp.float32)
    out_f32 = jax.block_until_ready(out_f32)
    assert out_f32.shape == (b, num_res, c_s)
    assert jnp.allclose(out_f32, ref, atol=1e-4, rtol=1e-4), "f32 mismatch vs reference"

    # 2) bf16-I/O path (the HBM-roofline configuration recommended for
    #    v5e/v6e/v7x): bf16 MXU operands + bf16 output, f32 accumulation.
    out_bf16 = node_embedder_forward(timesteps, mask, motif_mask, w_t, bias,
                                     c_pos_emb, c_timestep_emb, c_s,
                                     io_dtype=jnp.bfloat16, out_dtype=jnp.bfloat16)
    out_bf16 = jax.block_until_ready(out_bf16)
    assert out_bf16.shape == (b, num_res, c_s)
    assert jnp.allclose(out_bf16.astype(jnp.float32), ref,
                        atol=5e-2, rtol=5e-2), "bf16 mismatch vs reference"

    print("KERNEL_OK")
</pallas_src>

<mosaic_0001>
module attributes {stable_mosaic.version = 11 : i64} {
  func.func @node_embedder_kernel(%arg0: i32, %arg1: i32, %arg2: memref<16x128xf32, #tpu.memory_space<vmem>>, %arg3: memref<16x2xf32, #tpu.memory_space<vmem>>, %arg4: memref<1x128xf32, #tpu.memory_space<vmem>>, %arg5: memref<1x1x128xf32, #tpu.memory_space<vmem>>, %arg6: memref<128x128xf32, #tpu.memory_space<vmem>>, %arg7: memref<1x128xf32, #tpu.memory_space<vmem>>, %arg8: memref<16x128xf32, #tpu.memory_space<vmem>>) attributes {dimension_semantics = [#tpu.dimension_semantics<parallel>, #tpu.dimension_semantics<parallel>], iteration_bounds = array<i64: 1, 2>, scalar_prefetch = 0 : i64, scratch_operands = 0 : i64, tpu.core_type = #tpu.core_type<tc>, window_params = [{transform_indices = @transform_0, window_bounds = array<i64: 16, 128>}, {transform_indices = @transform_1, window_bounds = array<i64: 16, 2>}, {pipeline_mode = #tpu.pipeline_mode<synchronous>, transform_indices = @transform_2, window_bounds = array<i64: 1, 128>}, {transform_indices = @transform_3, window_bounds = array<i64: 1, 1, 128>}, {pipeline_mode = #tpu.pipeline_mode<synchronous>, transform_indices = @transform_4, window_bounds = array<i64: 128, 128>}, {pipeline_mode = #tpu.pipeline_mode<synchronous>, transform_indices = @transform_5, window_bounds = array<i64: 1, 128>}, {transform_indices = @transform_6, window_bounds = array<i64: 16, 128>}]} {
    %c0 = arith.constant 0 : index
    %c0_0 = arith.constant 0 : index
    %0 = vector.load %arg3[%c0, %c0_0] : memref<16x2xf32, #tpu.memory_space<vmem>>, vector<16x2xf32>
    %1 = vector.extract_strided_slice %0 {offsets = [0, 0], sizes = [16, 1], strides = [1, 1]} : vector<16x2xf32> to vector<16x1xf32>
    %2 = vector.extract_strided_slice %0 {offsets = [0, 1], sizes = [16, 1], strides = [1, 1]} : vector<16x2xf32> to vector<16x1xf32>
    %c0_1 = arith.constant 0 : index
    %c0_2 = arith.constant 0 : index
    %3 = vector.load %arg2[%c0_1, %c0_2] : memref<16x128xf32, #tpu.memory_space<vmem>>, vector<16x128xf32>
    %c0_3 = arith.constant 0 : index
    %c0_4 = arith.constant 0 : index
    %4 = vector.load %arg6[%c0_3, %c0_4] : memref<128x128xf32, #tpu.memory_space<vmem>>, vector<128x128xf32>
    %cst = arith.constant dense<0.000000e+00> : vector<16x128xf32>
    %5 = tpu.matmul %3, %4, %cst {dimension_numbers = #tpu.dot_dimension_numbers<[1], [0], [0], [1], [0, 0, 1, 1], [], []>} : vector<16x128xf32>, vector<128x128xf32>, vector<16x128xf32> -> vector<16x128xf32>
    %c0_5 = arith.constant 0 : index
    %c0_6 = arith.constant 0 : index
    %6 = vector.load %arg4[%c0_5, %c0_6] : memref<1x128xf32, #tpu.memory_space<vmem>>, vector<1x128xf32>
    %c0_7 = arith.constant 0 : index
    %c0_8 = arith.constant 0 : index
    %c0_9 = arith.constant 0 : index
    %7 = vector.load %arg5[%c0_7, %c0_8, %c0_9] : memref<1x1x128xf32, #tpu.memory_space<vmem>>, vector<1x1x128xf32>
    %8 = vector.shape_cast %7 : vector<1x1x128xf32> to vector<1x128xf32>
    %9 = vector.broadcast %2 : vector<16x1xf32> to vector<16x128xf32>
    %10 = vector.broadcast %8 : vector<1x128xf32> to vector<16x128xf32>
    %11 = arith.mulf %9, %10 : vector<16x128xf32>
    %12 = vector.broadcast %6 : vector<1x128xf32> to vector<16x128xf32>
    %13 = arith.addf %12, %11 : vector<16x128xf32>
    %14 = arith.addf %5, %13 : vector<16x128xf32>
    %15 = vector.broadcast %1 : vector<16x1xf32> to vector<16x128xf32>
    %16 = arith.mulf %15, %14 : vector<16x128xf32>
    %c0_10 = arith.constant 0 : index
    %c0_11 = arith.constant 0 : index
    %17 = vector.load %arg7[%c0_10, %c0_11] : memref<1x128xf32, #tpu.memory_space<vmem>>, vector<1x128xf32>
    %18 = vector.broadcast %17 : vector<1x128xf32> to vector<16x128xf32>
    %19 = arith.addf %16, %18 : vector<16x128xf32>
    %c0_12 = arith.constant 0 : index
    %c0_13 = arith.constant 0 : index
    %20 = vector.load %arg8[%c0_12, %c0_13] : memref<16x128xf32, #tpu.memory_space<vmem>>, vector<16x128xf32>
    tpu.vector_store %arg8[%c0_12, %c0_13], %19 {strides = array<i32>} : memref<16x128xf32, #tpu.memory_space<vmem>>, vector<16x128xf32>,
    return
  }
  func.func @transform_0(%arg0: i32, %arg1: i32) -> (i32, i32) {
    %c0_i32 = arith.constant 0 : i32
    %c0_i32_0 = arith.constant 0 : i32
    return %arg0, %c0_i32 : i32, i32
  }
  func.func @transform_1(%arg0: i32, %arg1: i32) -> (i32, i32) {
    %c1_i32 = arith.constant 1 : i32
    %0 = arith.muli %arg1, %c1_i32 : i32
    %1 = arith.addi %0, %arg0 : i32
    %c0_i32 = arith.constant 0 : i32
    %c0_i32_0 = arith.constant 0 : i32
    return %1, %c0_i32 : i32, i32
  }
  func.func @transform_2(%arg0: i32, %arg1: i32) -> (i32, i32) {
    %c0_i32 = arith.constant 0 : i32
    %c0_i32_0 = arith.constant 0 : i32
    %c0_i32_1 = arith.constant 0 : i32
    return %c0_i32, %c0_i32_0 : i32, i32
  }
  func.func @transform_3(%arg0: i32, %arg1: i32) -> (i32, i32, i32) {
    %c0_i32 = arith.constant 0 : i32
    %c0_i32_0 = arith.constant 0 : i32
    %c0_i32_1 = arith.constant 0 : i32
    return %arg1, %c0_i32, %c0_i32_0 : i32, i32, i32
  }
  func.func @transform_4(%arg0: i32, %arg1: i32) -> (i32, i32) {
    %c0_i32 = arith.constant 0 : i32
    %c0_i32_0 = arith.constant 0 : i32
    %c0_i32_1 = arith.constant 0 : i32
    return %c0_i32, %c0_i32_0 : i32, i32
  }
  func.func @transform_5(%arg0: i32, %arg1: i32) -> (i32, i32) {
    %c0_i32 = arith.constant 0 : i32
    %c0_i32_0 = arith.constant 0 : i32
    %c0_i32_1 = arith.constant 0 : i32
    return %c0_i32, %c0_i32_0 : i32, i32
  }
  func.func @transform_6(%arg0: i32, %arg1: i32) -> (i32, i32) {
    %c1_i32 = arith.constant 1 : i32
    %0 = arith.muli %arg1, %c1_i32 : i32
    %1 = arith.addi %0, %arg0 : i32
    %c0_i32 = arith.constant 0 : i32
    %c0_i32_0 = arith.constant 0 : i32
    return %1, %c0_i32 : i32, i32
  }
}

</mosaic_0001>

<bundles_post_ra>
// kernel: tpu_custom_call.1
= control target key start
LH: loop header
LB: loop body
LE: loop exit
PB: predicated region body
PF: predicated region fallthrough
CT: control target
= control target key end

     0   :  { %11 = vsyncpa [#allocation3], 0  ;;  %s1042_s0 = inlined_call_operand.vmem [shape: f32[16,128], index: 0, kind: input, shape index: {}]   ;;  %s1043_s1 = inlined_call_operand.vmem [shape: f32[32,2], index: 1, kind: input, shape index: {}]   ;;  %s1044_s2 = inlined_call_operand.vmem [shape: f32[1,128], index: 2, kind: input, shape index: {}]   ;;  %s1045_s3 = inlined_call_operand.vmem [shape: f32[2,1,128], index: 3, kind: input, shape index: {}]   ;;  %s1046_s4 = inlined_call_operand.hbm [shape: f32[128,128], index: 4, kind: input, shape index: {}]   ;;  %s1047_s5 = inlined_call_operand.vmem [shape: f32[1,128], index: 5, kind: input, shape index: {}]   ;;  %s1048_s6 = inlined_call_operand.hbm [shape: f32[32,128], index: 6, kind: output, shape index: {}]  }
   0x1   :  { %12 = vsyncpa [#allocation4], 0 }
   0x2   :  { %14 = vsyncpa [#allocation4 + $0x1], 0  ;;  %s891_s21 = smov 0   ;;  %s893_s22 = smov 0  }
   0x3   :  { %s895_s23 = smov 0   ;;  %s897_s24 = smov 0  }
   0x4   :  { %s899_s25 = smov 0   ;;  %s901_s26 = smov 0  }
   0x5 LB: > { %s592_s27 = sadd.s32 4294967295, %s846_s26   ;;  %s593_s28 = sadd.s32 4294967294, %s846_s26   ;;  %s846_s26 = sphi %s901_s26, %s20_s26   ;;  %s842_s25 = sphi %s899_s25, %s1057_s25   ;;  %s838_s24 = sphi %s897_s24, %s1056_s24   ;;  %s834_s23 = sphi %s895_s23, %s1055_s23   ;;  %s830_s22 = sphi %s893_s22, %s1054_s22   ;;  %s826_s21 = sphi %s891_s21, %s1053_s21  }
   0x6   : > { %s29_s29 = sadd.s32 1, %s842_s25  ;;  %s184_s30 = sadd.s32 1, %s834_s23 }
   0x7   : > { %p30_p0 = scmp.ge.s32.totalorder %s29_s29, 2  ;;  %p194_p1 = scmp.ne.s32.totalorder %s834_s23, %s830_s22 }
   0x8   : > { %p195_p2 = scmp.eq.s32.totalorder %s592_s27, 1  ;;  %p200_p3 = scmp.ne.s32.totalorder %s830_s22, %s826_s21 }
   0x9   : > { %s1059_s29 = smov (%p30_p0, %s29_s29), 0  ;;  %p201_p5 = scmp.eq.s32.totalorder %s593_s28, 1 }
   0xa   : > { %p931_p4 = por %p195_p2, %p194_p1  ;;  %s181_s8 = ssub.s32 %s842_s25, %s1059_s29 }
   0xb   : > { %p594_p6 = scmp.ge.s32.totalorder %s846_s26, 1  ;;  %p182_p7 = scmp.eq.s32.totalorder %s181_s8, 0 }
   0xc   : > { %p938_p8 = por %p201_p5, %p200_p3  ;;  %p208_p9 = scmp.lt.s32.totalorder %s846_s26, 3 }
   0xd   : > { %s944_s10 = scalar_select %p182_p7, %s834_s23, %s184_s30  }
   0xe   : > { %p946_p10 = pnand %p594_p6, %p208_p9  ;;  %p950_p11 = scmp.eq.s32.totalorder %s592_s27, 0 }
   0xf   : > { %s848_s13 = smov [#allocation2]  }
  0x10   : > { %p671_p12 = pneg %p946_p10  ;;  %s232_s14 = sshll.u32 %s848_s13, 4  ;;  %s233_s14 = int_to_ptr.vmem [resolvable:$true] %s232_s14 }
  0x11   : > { %s751_s15 = scalar_lea.vmem %s233_s14, 2048  ;;  %p759_p5 = scmp.lt.s32.totalorder %s233_s14, %s233_s14 }
  0x12   : > { %p672_p13 = pnand %p950_p11, %p671_p12  ;;  %p752_p1 = scmp.ne.s32.totalorder %s233_s14, %s751_s15 }
  0x13   : > { %p760_p6 = scmp.lt.s32.totalorder %s751_s15, %s751_s15 }
  0x14   : > { %p742_p0 = pneg %p672_p13 }
  0x15   : > { %p761_p7 = por %p760_p6, %p759_p5 }
  0x16   : > { %p754_p2 = pnand %p752_p1, %p742_p0 }
  0x18   : > { %p755_p3 = pneg %p754_p2 }
  0x1a   : > { %p762_p9 = pnand %p761_p7, %p755_p3 }
  0x1c   : > { %765 = shalt.err (!%p762_p9)
}
  0x1d   : > { %s849_s16 = smov 128   ;;  %s850_s17 = smov 8  }
  0x1e   : > { %674 = dma.hbm_to_vmem [thread:$0]  (!%p672_p13), %s1046_s4, 2048, %s233_s14, [#allocation3], %s849_s16, %s849_s16, %s850_s17  }
  0x1f   : > { %268 = sbr.rel (%p946_p10) target bundleno = 286 (0x11e), region = 44 }
  0x24   : > { %817 = dma.done.wait (%p950_p11), [#allocation3], 2048  }
  0x25   : > { %819 = vsyncadd (%p950_p11), [#allocation3], 4294965248  ;;  %s601_s20 = sshll.u32 %s838_s24, 1  ;;  %v851_v0 = vmov 1   ;;  %v852_v1 = vmov 0   ;;  %v345_v2 = vld [vmem:[#allocation2 + $0x78] sm:$0xff] }
  0x26   : > { %737 = vset.pattern.permute.xlu0 %v851_v0  ;;  %p315_p12 = scmp.lt.s32.totalorder %s601_s20, 3  ;;  %738 = vset.pattern.permute.xlu1 %v852_v1  ;;  %v344_v3 = vld [vmem:[#allocation2 + $0x70] sm:$0xff]  ;;  %v343_v4 = vld [vmem:[#allocation2 + $0x68] sm:$0xff]  ;;  %v342_v5 = vld [vmem:[#allocation2 + $0x60] sm:$0xff]  ;;  %p321_p10 = scmp.lt.s32.totalorder %s838_s24, 1 }
  0x27   : > { %630 = vmatprep.subr.mxu0 %v345_v2  ;;  %v328_v6 = vld [vmem:[%s1042_s0] sm:$0xff]  ;;  %v341_v7 = vld [vmem:[#allocation2 + $0x58] sm:$0xff]  ;;  %v340_v9 = vld [vmem:[#allocation2 + $0x50] sm:$0xff]  ;;  %s304_s19 = sand.u32 1, %s830_s22   ;;  %s611_s13 = sshll.u32 %s838_s24, 8 }
  0x28   : > { %s1061_s20 = smov (!%p315_p12, %s601_s20), 3  ;;  %631 = vmatpush3.msra.mxu0 %v345_v2  ;;  %662 = vmatprep.mubr.f32.mxu0 %v328_v6  ;;  %v339_v11 = vld [vmem:[#allocation2 + $0x48] sm:$0xff]  ;;  %v338_v12 = vld [vmem:[#allocation2 + $0x40] sm:$0xff]  ;;  %v337_v13 = vld [vmem:[#allocation2 + $0x38] sm:$0xff]  ;;  %s600_s28 = sshll.u32 %s304_s19, 4 }
  0x29   : > { %s602_s27 = sshll.u32 %s1061_s20, 3  ;;  %632 = vmatprep.subr.mxu0 %v344_v3  ;;  %v336_v14 = vld [vmem:[#allocation2 + $0x30] sm:$0xff]  ;;  %v335_v15 = vld [vmem:[#allocation2 + $0x28] sm:$0xff]  ;;  %v334_v16 = vld [vmem:[#allocation2 + $0x20] sm:$0xff]  ;;  %s306_s11 = scalar_lea.vmem [#allocation5], %s600_s28 }
  0x2a   : > { %s318_s8 = scalar_lea.vmem %s1043_s1, %s602_s27  ;;  %633 = vmatpush3.msra.mxu0 %v344_v3  ;;  %v333_v17 = vld [vmem:[#allocation2 + $0x18] sm:$0xff]  ;;  %v332_v18 = vld [vmem:[#allocation2 + $0x10] sm:$0xff]  ;;  %v331_v19 = vld [vmem:[#allocation2 + $0x8] sm:$0xff]  ;;  %s485_s12 = sshll.u32 %s306_s11, 4  ;;  %s990_s12 = int_to_ptr.vmem [resolvable:$true] %s485_s12 }
  0x2b   : > { %634 = vmatprep.subr.mxu0 %v343_v4  ;;  %v326_v8 = vld [vmem:[%s318_s8] sm:$0xff]  ;;  %v327_v10 = vld [vmem:[%s318_s8 + $0x8] sm:$0xff]  ;;  %s322_s15 = scalar_select %p321_p10, %s838_s24, 1 }
  0x2c   : > { %635 = vmatpush3.msra.mxu0 %v343_v4  ;;  %350 = vperm.xlu0 %737, %v326_v8   ;;  %v330_v20 = vld [vmem:[#allocation2] sm:$0xff]  ;;  %v329_v21 = vld [vmem:[%s1042_s0 + $0x8] sm:$0xff]  ;;  %s995_s16 = scalar_lea.hbm %s1048_s6, %s611_s13  ;;  %s997_s17 = scalar_lea.sflag [#allocation4], %s304_s19 }
  0x2d   : > { %636 = vmatprep.subr.mxu0 %v342_v5  ;;  %450 = vperm.xlu1 %738, %v326_v8   ;;  %s323_s18 = scalar_lea.vmem %s1045_s3, %s322_s15  ;;  %v604_v27 = vld [vmem:[%s1044_s2] ss:$0 sm:$0xff]  ;;  %s853_s24 = smov [#allocation5]  }
  0x2e   : > { %637 = vmatpush3.msra.mxu0 %v342_v5  ;;  %v603_v23 = vld [vmem:[%s323_s18] ss:$0 sm:$0xff]  ;;  %s766_s18 = scalar_lea.vmem %s990_s12, 256  ;;  %s770_s20 = sshll.u32 %s853_s24, 4  ;;  %s771_s20 = int_to_ptr.vmem [resolvable:$false] %s770_s20 }
  0x2f   : > { %638 = vmatprep.subr.mxu0 %v341_v7  ;;  %v605_v33 = vld [vmem:[%s1047_s5] ss:$0 sm:$0xff]  ;;  %p767_p11 = scmp.ne.s32.totalorder %s990_s12, %s766_s18  ;;  %s772_s27 = scalar_lea.vmem %s771_s20, 512 }
  0x30   : > { %639 = vmatpush3.msra.mxu0 %v341_v7  ;;  %355 = vperm.xlu0 %737, %v327_v10   ;;  %p773_p1 = scmp.lt.s32.totalorder %s990_s12, %s771_s20  ;;  %p774_p2 = scmp.lt.s32.totalorder %s772_s27, %s766_s18 }
  0x31   : > { %640 = vmatprep.subr.mxu0 %v340_v9  ;;  %454 = vperm.xlu1 %738, %v327_v10   ;;  %p768_p13 = pnand %p767_p11, %p931_p4 }
  0x32   : > { %641 = vmatpush3.msra.mxu0 %v340_v9  ;;  %p775_p3 = por %p774_p2, %p773_p1 }
  0x33   : > { %642 = vmatprep.subr.mxu0 %v339_v11  ;;  %p769_p0 = pneg %p768_p13 }
  0x34   : > { %643 = vmatpush3.msra.mxu0 %v339_v11  ;;  %739 = vset.pattern.permute.xlu0 %v852_v1 }
  0x35   : > { %644 = vmatprep.subr.mxu0 %v338_v12  ;;  %p776_p5 = pnand %p775_p3, %p769_p0 }
  0x36   : > { %645 = vmatpush3.msra.mxu0 %v338_v12 }
  0x37   : > { %646 = vmatprep.subr.mxu0 %v337_v13 }
  0x38   : > { %647 = vmatpush3.msra.mxu0 %v337_v13 }
  0x39   : > { %648 = vmatprep.subr.mxu0 %v336_v14 }
  0x3a   : > { %649 = vmatpush3.msra.mxu0 %v336_v14 }
  0x3b   : > { %650 = vmatprep.subr.mxu0 %v335_v15 }
  0x3c   : > { %651 = vmatpush3.msra.mxu0 %v335_v15 }
  0x3d   : > { %652 = vmatprep.subr.mxu0 %v334_v16 }
  0x3e   : > { %653 = vmatpush3.msra.mxu0 %v334_v16 }
  0x3f   : > { %654 = vmatprep.subr.mxu0 %v333_v17 }
  0x40   : > { %655 = vmatpush3.msra.mxu0 %v333_v17 }
  0x41   : > { %656 = vmatprep.subr.mxu0 %v332_v18 }
  0x42   : > { %657 = vmatpush3.msra.mxu0 %v332_v18 }
  0x43   : > { %658 = vmatprep.subr.mxu0 %v331_v19 }
  0x44   : > { %659 = vmatpush3.msra.mxu0 %v331_v19 }
  0x45   : > { %660 = vmatprep.subr.mxu0 %v330_v20 }
  0x46   : > { %661 = vmatpush3.msra.mxu0 %v330_v20 }
  0x47   : > { %663 = vmatmul.mubr.f32.vlgmr.msra.gmra.mxu0 %v329_v21 }
  0xa7   : > { %v351_v22 = vpop.permute.xlu0 %350 }
  0xa8   : > { %v451_v26 = vpop.permute.xlu1 %450  ;;  %v364_v28 = vmul.f32 %v603_v23, %v351_v22 }
  0xaa   : > { %v372_v32 = vadd.f32 %v604_v27, %v364_v28 }
  0xab   : > { %v356_v24 = vpop.permute.xlu0 %355 }
  0xac   : > { %v365_v25 = vmul.f32 %v603_v23, %v356_v24  ;;  %v455_v34 = vpop.permute.xlu1 %454 }
  0xae   : > { %v373_v29 = vadd.f32 %v604_v27, %v365_v25 }
 0x107   : > { %v664_v30 = vpop.f32.mrf.mxu0 }
 0x108   : > { %v446_v31 = vadd.f32 %v664_v30, %v373_v29 }
 0x109   : > { %v440_v35 = vpop.f32.mrf.mxu0 }
 0x10a   : > { %v458_v36 = vmul.f32 %v455_v34, %v446_v31  ;;  %v441_v37 = vadd.f32 %v440_v35, %v372_v32 }
 0x10c   : > { %v467_v38 = vadd.f32 %v605_v33, %v458_v36  ;;  %v457_v39 = vmul.f32 %v451_v26, %v441_v37 }
 0x10e   : > { %469 = vst [vmem:[%s306_s11 + $0x8] sm:$0xff] %v467_v38  ;;  %v466_v40 = vadd.f32 %v605_v33, %v457_v39 }
 0x110   : > { %468 = vst [vmem:[%s306_s11] sm:$0xff] %v466_v40 }
 0x111   : > { %779 = shalt.err (!%p776_p5)
}
 0x112   : > { %s780_s19 = scalar_lea.hbm %s995_s16, 256  ;;  %s784_s8 = scalar_lea.hbm %s1048_s6, 512 }
 0x113   : > { %p781_p6 = scmp.ne.s32.totalorder %s995_s16, %s780_s19  ;;  %p785_p12 = scmp.lt.s32.totalorder %s995_s16, %s1048_s6 }
 0x114   : > { %p786_p10 = scmp.lt.s32.totalorder %s784_s8, %s780_s19 }
 0x115   : > { %p782_p7 = pnand %p781_p6, %p931_p4 }
 0x116   : > { %p787_p11 = por %p786_p10, %p785_p12 }
 0x117   : > { %p783_p9 = pneg %p782_p7 }
 0x119   : > { %p788_p13 = pnand %p787_p11, %p783_p9 }
 0x11b   : > { %791 = shalt.err (!%p788_p13)
}
 0x11c   : > { %s854_s14 = smov 128   ;;  %s855_s15 = smov 8  }
 0x11d   : > { %669 = dma.vmem_to_hbm [thread:$0]  (%p931_p4), %s990_s12, 256, %s995_s16, %s997_s17, %s854_s14, %s854_s14, %s855_s15  }
 0x11e PF: > { %p681_p0 = scmp.ge.s32.totalorder %s846_s26, 2  ;;  %s500_s18 = sand.u32 1, %s826_s21  }
 0x11f   : > { %s501_s24 = scalar_lea.sflag [#allocation4], %s500_s18 }
 0x120   : > { %p676_p1 = pnand %p681_p0, %p938_p8 }
 0x122   : > { %p677_p2 = pneg %p676_p1 }
 0x124   : > { %821 = dma.done.wait (%p677_p2), %s501_s24, 256  }
 0x125   : > { %823 = vsyncadd (%p677_p2), %s501_s24, 4294967040  ;;  %s20_s26 = sadd.s32 1, %s846_s26   ;;  %s1053_s21 = smov %s830_s22 }
 0x126   : > { %p17_p3 = scmp.ge.s32.totalorder %s20_s26, 4   ;;  %s1054_s22 = smov %s834_s23 }
 0x127   : > { %s1055_s23 = smov %s944_s10  ;;  %s1056_s24 = smov %s842_s25 }
 0x128   : > { %s1057_s25 = smov %s1059_s29  ;;  %19 = sbr.rel (!%p17_p3) target bundleno = 5 (0x5), region = 90 }
 0x12d   :  { %506 = vsyncpa [#allocation3], 1 }
 0x12e   :  { %508 = vsyncpa [#allocation3 + $0x1], 1 }
 0x12f   :  { %509 = vsyncpa [#allocation4], 1 }
 0x130   :  { %511 = vsyncpa [#allocation4 + $0x1], 1 }

</bundles_post_ra>
